<compile_context>
chip_gen: v7x
topology: tpu7x:2x2x1
jax: 0.10.0
libtpu: 0.0.40
codegen_flags: <defaults>
</compile_context>

<pallas_src>
import functools

import jax
import jax.numpy as jnp
from jax import lax
from jax.experimental import pallas as pl
from jax.experimental.pallas import tpu as pltpu


def _round_up(n: int, m: int) -> int:
    return ((n + m - 1) // m) * m


def _cross_layer_kernel(x0_ref, x_ref, w_ref, b_ref, *rest, matmul_dtype=None):
    """One batch tile of the cross layer.

    x0_ref, x_ref : (tm, Dp)  VMEM
    w_ref         : (Dp, Dp)  VMEM  (PyTorch layout: w[out, in]; resident)
    b_ref         : (1, Dp)   VMEM
    mask_ref      : (tm, Dp)  VMEM  (optional; pre-scaled keep/(1-p) dropout mask)
    o_ref         : (tm, Dp)  VMEM
    """
    if len(rest) == 2:
        mask_ref, o_ref = rest
    else:
        mask_ref = None
        (o_ref,) = rest

    x = x_ref[...]
    x0 = x0_ref[...]

    lhs = x
    rhs = w_ref[...]
    if matmul_dtype is not None:
        lhs = lhs.astype(matmul_dtype)
        rhs = rhs.astype(matmul_dtype)

    # linear(x) = x @ W^T + b  -> contract x's dim 1 with w's dim 1 on the MXU,
    # f32 accumulate.  No transposed copy of W is ever materialized.
    lin = lax.dot_general(
        lhs, rhs,
        dimension_numbers=(((1,), (1,)), ((), ())),
        preferred_element_type=jnp.float32,
    )
    lin = lin + b_ref[...].astype(jnp.float32)

    cross = x0.astype(jnp.float32) * lin

    if mask_ref is not None:
        # mask is already keep/(1-p): a single VPU multiply.
        cross = cross * mask_ref[...].astype(jnp.float32)

    o_ref[...] = (cross + x.astype(jnp.float32)).astype(o_ref.dtype)


def cross_layer(x0, x, w, b, *, dropout_rate: float = 0.0, rng_key=None,
                tile_m: int = 256, matmul_dtype=None,
                vmem_limit_bytes: int = 64 * 1024 * 1024):
    """Pallas implementation of CrossLayer.forward(x0, x).

    x0, x : (B, D) float32
    w     : (D, D) float32  -- nn.Linear weight (PyTorch convention, w[out, in])
    b     : (D,)   float32  -- nn.Linear bias
    dropout_rate > 0 applies training-mode dropout (keep prob 1-p, scaled by
    1/(1-p)); the mask is drawn from `rng_key` with jax.random (distribution
    matches PyTorch, bits do not).
    """
    B, D = x.shape
    assert x0.shape == (B, D) and w.shape == (D, D) and b.shape == (D,)

    # Lane-dense feature dim and ragged-batch handling via zero padding.
    Dp = _round_up(D, 128)
    tm = _round_up(min(int(tile_m), _round_up(B, 8)), 8)
    Bp = _round_up(B, tm)

    def pad_act(a):
        if Bp == B and Dp == D:
            return a
        return jnp.pad(a, ((0, Bp - B), (0, Dp - D)))

    x0p = pad_act(x0)
    xp = pad_act(x)
    wp = w if Dp == D else jnp.pad(w, ((0, Dp - D), (0, Dp - D)))
    if matmul_dtype is not None:
        wp = wp.astype(matmul_dtype)        # halves weight DMA on bf16 MXU path
    bp = (b if Dp == D else jnp.pad(b, (0, Dp - D))).reshape(1, Dp)

    inputs = [x0p, xp, wp, bp]
    in_specs = [
        pl.BlockSpec((tm, Dp), lambda i: (i, 0)),   # x0
        pl.BlockSpec((tm, Dp), lambda i: (i, 0)),   # x
        # Resident weight (constant index map -> fetched once per core).
        # For very large D on v7x, single-buffer it (pl.Buffered(1)) / K-N tile.
        pl.BlockSpec((Dp, Dp), lambda i: (0, 0)),   # w
        pl.BlockSpec((1, Dp), lambda i: (0, 0)),    # bias
    ]

    if dropout_rate > 0.0:
        if rng_key is None:
            rng_key = jax.random.PRNGKey(0)
        keep_prob = 1.0 - float(dropout_rate)
        keep = jax.random.bernoulli(rng_key, keep_prob, (Bp, Dp))
        mask = keep.astype(jnp.float32) * (1.0 / keep_prob)
        inputs.append(mask)
        in_specs.append(pl.BlockSpec((tm, Dp), lambda i: (i, 0)))

    kernel = functools.partial(_cross_layer_kernel, matmul_dtype=matmul_dtype)

    out = pl.pallas_call(
        kernel,
        out_shape=jax.ShapeDtypeStruct((Bp, Dp), x.dtype),
        grid=(Bp // tm,),
        in_specs=in_specs,
        out_specs=pl.BlockSpec((tm, Dp), lambda i: (i, 0)),
        compiler_params=pltpu.CompilerParams(
            dimension_semantics=("parallel",),      # batch axis shards across TCs
            vmem_limit_bytes=vmem_limit_bytes,
        ),
    )(*inputs)

    if Bp == B and Dp == D:
        return out
    return out[:B, :D]


def cross_layer_ref(x0, x, w, b):
    """Pure-JAX reference (dropout in eval mode == identity)."""
    return x0 * (x @ w.T + b) + x


if __name__ == "__main__":
    key = jax.random.PRNGKey(0)
    k_x0, k_x, k_w, k_b, k_drop = jax.random.split(key, 5)

    B, D = 16, 32
    x0 = jax.random.normal(k_x0, (B, D), dtype=jnp.float32)
    x = jax.random.normal(k_x, (B, D), dtype=jnp.float32)

    # nn.Linear(d, d)-style init: weight (D, D), bias (D,), U(-1/sqrt(D), 1/sqrt(D)).
    bound = 1.0 / (D ** 0.5)
    w = jax.random.uniform(k_w, (D, D), minval=-bound, maxval=bound,
                           dtype=jnp.float32)
    b = jax.random.uniform(k_b, (D,), minval=-bound, maxval=bound,
                           dtype=jnp.float32)

    # Deterministic path (dropout_rate=0 == PyTorch eval mode / p=0).
    out = jax.block_until_ready(cross_layer(x0, x, w, b, dropout_rate=0.0))
    ref = cross_layer_ref(x0, x, w, b)
    assert out.shape == (B, D)
    assert jnp.allclose(out, ref, atol=1e-5, rtol=1e-5), "mismatch vs reference"

    # Dropout path (stochastic): smoke-test shape + finiteness.
    out_drop = jax.block_until_ready(
        cross_layer(x0, x, w, b, dropout_rate=0.1, rng_key=k_drop))
    assert out_drop.shape == (B, D)
    assert bool(jnp.all(jnp.isfinite(out_drop)))

    print("KERNEL_OK")
</pallas_src>

<mosaic_0001>
module attributes {stable_mosaic.version = 11 : i64} {
  func.func @_cross_layer_kernel(%arg0: i32, %arg1: memref<16x128xf32, #tpu.memory_space<vmem>>, %arg2: memref<16x128xf32, #tpu.memory_space<vmem>>, %arg3: memref<128x128xf32, #tpu.memory_space<vmem>>, %arg4: memref<1x128xf32, #tpu.memory_space<vmem>>, %arg5: memref<16x128xf32, #tpu.memory_space<vmem>>) attributes {dimension_semantics = [#tpu.dimension_semantics<parallel>], iteration_bounds = array<i64: 1>, scalar_prefetch = 0 : i64, scratch_operands = 0 : i64, tpu.core_type = #tpu.core_type<tc>, window_params = [{transform_indices = @transform_0, window_bounds = array<i64: 16, 128>}, {transform_indices = @transform_1, window_bounds = array<i64: 16, 128>}, {pipeline_mode = #tpu.pipeline_mode<synchronous>, transform_indices = @transform_2, window_bounds = array<i64: 128, 128>}, {pipeline_mode = #tpu.pipeline_mode<synchronous>, transform_indices = @transform_3, window_bounds = array<i64: 1, 128>}, {transform_indices = @transform_4, window_bounds = array<i64: 16, 128>}]} {
    %c0 = arith.constant 0 : index
    %c0_0 = arith.constant 0 : index
    %0 = vector.load %arg2[%c0, %c0_0] : memref<16x128xf32, #tpu.memory_space<vmem>>, vector<16x128xf32>
    %c0_1 = arith.constant 0 : index
    %c0_2 = arith.constant 0 : index
    %1 = vector.load %arg1[%c0_1, %c0_2] : memref<16x128xf32, #tpu.memory_space<vmem>>, vector<16x128xf32>
    %c0_3 = arith.constant 0 : index
    %c0_4 = arith.constant 0 : index
    %2 = vector.load %arg3[%c0_3, %c0_4] : memref<128x128xf32, #tpu.memory_space<vmem>>, vector<128x128xf32>
    %cst = arith.constant dense<0.000000e+00> : vector<16x128xf32>
    %3 = tpu.matmul %0, %2, %cst {dimension_numbers = #tpu.dot_dimension_numbers<[1], [1], [0], [0], [0, 0, 1, 0], [], []>} : vector<16x128xf32>, vector<128x128xf32>, vector<16x128xf32> -> vector<16x128xf32>
    %c0_5 = arith.constant 0 : index
    %c0_6 = arith.constant 0 : index
    %4 = vector.load %arg4[%c0_5, %c0_6] : memref<1x128xf32, #tpu.memory_space<vmem>>, vector<1x128xf32>
    %5 = vector.broadcast %4 : vector<1x128xf32> to vector<16x128xf32>
    %6 = arith.addf %3, %5 : vector<16x128xf32>
    %7 = arith.mulf %1, %6 : vector<16x128xf32>
    %8 = arith.addf %7, %0 : vector<16x128xf32>
    %c0_7 = arith.constant 0 : index
    %c0_8 = arith.constant 0 : index
    %9 = vector.load %arg5[%c0_7, %c0_8] : memref<16x128xf32, #tpu.memory_space<vmem>>, vector<16x128xf32>
    tpu.vector_store %arg5[%c0_7, %c0_8], %8 {strides = array<i32>} : memref<16x128xf32, #tpu.memory_space<vmem>>, vector<16x128xf32>,
    return
  }
  func.func @transform_0(%arg0: i32) -> (i32, i32) {
    %c0_i32 = arith.constant 0 : i32
    %c0_i32_0 = arith.constant 0 : i32
    return %arg0, %c0_i32 : i32, i32
  }
  func.func @transform_1(%arg0: i32) -> (i32, i32) {
    %c0_i32 = arith.constant 0 : i32
    %c0_i32_0 = arith.constant 0 : i32
    return %arg0, %c0_i32 : i32, i32
  }
  func.func @transform_2(%arg0: i32) -> (i32, i32) {
    %c0_i32 = arith.constant 0 : i32
    %c0_i32_0 = arith.constant 0 : i32
    %c0_i32_1 = arith.constant 0 : i32
    return %c0_i32, %c0_i32_0 : i32, i32
  }
  func.func @transform_3(%arg0: i32) -> (i32, i32) {
    %c0_i32 = arith.constant 0 : i32
    %c0_i32_0 = arith.constant 0 : i32
    %c0_i32_1 = arith.constant 0 : i32
    return %c0_i32, %c0_i32_0 : i32, i32
  }
  func.func @transform_4(%arg0: i32) -> (i32, i32) {
    %c0_i32 = arith.constant 0 : i32
    %c0_i32_0 = arith.constant 0 : i32
    return %arg0, %c0_i32 : i32, i32
  }
}

</mosaic_0001>

<bundles_post_ra>
// kernel: tpu_custom_call.1
= control target key start
LH: loop header
LB: loop body
LE: loop exit
PB: predicated region body
PF: predicated region fallthrough
CT: control target
= control target key end

     0   :  { %9 = vsyncpa [#allocation3], 0  ;;  %s520_s0 = inlined_call_operand.hbm [shape: f32[16,128], index: 0, kind: input, shape index: {}]   ;;  %s521_s1 = inlined_call_operand.hbm [shape: f32[16,128], index: 1, kind: input, shape index: {}]   ;;  %s522_s2 = inlined_call_operand.hbm [shape: f32[128,128], index: 2, kind: input, shape index: {}]   ;;  %s523_s3 = inlined_call_operand.hbm [shape: f32[1,128], index: 3, kind: input, shape index: {}]   ;;  %s524_s4 = inlined_call_operand.hbm [shape: f32[16,128], index: 4, kind: output, shape index: {}]  }
   0x1   :  { %10 = vsyncpa [#allocation6], 0 }
   0x2   :  { %11 = vsyncpa [#allocation9], 0 }
   0x3   :  { %12 = vsyncpa [#allocation4], 0  ;;  %s409_s15 = smov [#allocation5]   ;;  %s410_s17 = smov [#allocation2]  }
   0x4   :  { %s30_s16 = sshll.u32 %s409_s15, 4  ;;  %s18_s18 = sshll.u32 %s410_s17, 4  ;;  %s31_s16 = int_to_ptr.vmem [resolvable:$true] %s30_s16  ;;  %s441_s18 = int_to_ptr.vmem [resolvable:$true] %s18_s18 }
   0x5   :  { %s291_s21 = scalar_lea.hbm %s521_s1, 256 }
   0x6   :  { %p292_p0 = scmp.ne.s32.totalorder %s521_s1, %s291_s21  ;;  %p295_p1 = scmp.lt.u32.totalorder %s291_s21, %s521_s1 }
   0x8   :  { %p297_p2 = pnand %p295_p1, %p292_p0 }
   0xa   :  { %300 = shalt.err (!%p297_p2)
}
   0xb   :  { %s301_s26 = scalar_lea.vmem %s31_s16, 256  ;;  %p306_p4 = scmp.lt.s32.totalorder %s31_s16, %s31_s16 }
   0xc   :  { %p302_p3 = scmp.ne.s32.totalorder %s31_s16, %s301_s26  ;;  %p307_p5 = scmp.lt.s32.totalorder %s301_s26, %s301_s26 }
   0xe   :  { %p308_p6 = por %p307_p5, %p306_p4 }
  0x10   :  { %p309_p7 = pnand %p308_p6, %p302_p3 }
  0x12   :  { %312 = shalt.err (!%p309_p7)
}
  0x13   :  { %s411_s27 = smov 128   ;;  %s412_s28 = smov 8  }
  0x14   :  { %36 = dma.hbm_to_vmem [thread:$0]  %s521_s1, 256, %s31_s16, [#allocation6], %s411_s27, %s411_s27, %s412_s28  }
  0x15   :  { %s313_s7 = scalar_lea.hbm %s520_s0, 256 }
  0x16   :  { %p314_p8 = scmp.ne.s32.totalorder %s520_s0, %s313_s7  ;;  %p317_p9 = scmp.lt.u32.totalorder %s313_s7, %s520_s0 }
  0x18   :  { %p319_p10 = pnand %p317_p9, %p314_p8 }
  0x1a   :  { %322 = shalt.err (!%p319_p10)
}
  0x1b   :  { %s323_s12 = scalar_lea.vmem %s441_s18, 256  ;;  %p328_p12 = scmp.lt.s32.totalorder %s441_s18, %s441_s18 }
  0x1c   :  { %p324_p11 = scmp.ne.s32.totalorder %s441_s18, %s323_s12  ;;  %p329_p13 = scmp.lt.s32.totalorder %s323_s12, %s323_s12 }
  0x1e   :  { %p330_p0 = por %p329_p13, %p328_p12 }
  0x20   :  { %p331_p1 = pnand %p330_p0, %p324_p11 }
  0x22   :  { %334 = shalt.err (!%p331_p1)
}
  0x23   :  { %24 = dma.hbm_to_vmem [thread:$0]  %s520_s0, 256, %s441_s18, [#allocation3], %s411_s27, %s411_s27, %s412_s28  }
  0x24   :  { %s413_s14 = smov [#allocation7]   ;;  %s414_s16 = smov [#allocation8]  }
  0x25   :  { %s42_s15 = sshll.u32 %s413_s14, 4  ;;  %s55_s17 = sshll.u32 %s414_s16, 4  ;;  %s43_s15 = int_to_ptr.vmem [resolvable:$true] %s42_s15  ;;  %s56_s17 = int_to_ptr.vmem [resolvable:$true] %s55_s17 }
  0x26   :  { %s335_s21 = scalar_lea.hbm %s522_s2, 2048 }
  0x27   :  { %p336_p2 = scmp.ne.s32.totalorder %s522_s2, %s335_s21  ;;  %p339_p3 = scmp.lt.u32.totalorder %s335_s21, %s522_s2 }
  0x29   :  { %p341_p4 = pnand %p339_p3, %p336_p2 }
  0x2b   :  { %344 = shalt.err (!%p341_p4)
}
  0x2c   :  { %s345_s0 = scalar_lea.vmem %s43_s15, 2048  ;;  %p350_p6 = scmp.lt.s32.totalorder %s43_s15, %s43_s15 }
  0x2d   :  { %p346_p5 = scmp.ne.s32.totalorder %s43_s15, %s345_s0  ;;  %p351_p7 = scmp.lt.s32.totalorder %s345_s0, %s345_s0 }
  0x2f   :  { %p352_p8 = por %p351_p7, %p350_p6 }
  0x31   :  { %p353_p9 = pnand %p352_p8, %p346_p5 }
  0x33   :  { %356 = shalt.err (!%p353_p9)
}
  0x34   :  { %48 = dma.hbm_to_vmem [thread:$0]  %s522_s2, 2048, %s43_s15, [#allocation6], %s411_s27, %s411_s27, %s412_s28  }
  0x35   :  { %s357_s5 = scalar_lea.hbm %s523_s3, 16 }
  0x36   :  { %p358_p10 = scmp.ne.s32.totalorder %s523_s3, %s357_s5  ;;  %p361_p11 = scmp.lt.u32.totalorder %s357_s5, %s523_s3 }
  0x38   :  { %p363_p12 = pnand %p361_p11, %p358_p10 }
  0x3a   :  { %366 = shalt.err (!%p363_p12)
}
  0x3b   :  { %s367_s10 = scalar_lea.vmem %s56_s17, 16  ;;  %s371_s11 = scalar_lea.vmem %s56_s17, 32 }
  0x3c   :  { %p368_p13 = scmp.ne.s32.totalorder %s56_s17, %s367_s10  ;;  %p372_p0 = scmp.lt.s32.totalorder %s56_s17, %s56_s17 }
  0x3d   :  { %p373_p1 = scmp.lt.s32.totalorder %s371_s11, %s367_s10 }
  0x3f   :  { %p374_p2 = por %p373_p1, %p372_p0 }
  0x41   :  { %p375_p3 = pnand %p374_p2, %p368_p13 }
  0x43   :  { %378 = shalt.err (!%p375_p3)
}
  0x44   :  { %58 = dma.hbm_to_vmem [thread:$0]  %s523_s3, 16, %s56_s17, [#allocation9]  }
  0x45   :  { %401 = dma.done.wait [#allocation3], 256  }
  0x46   :  { %402 = vsyncadd [#allocation3], 4294967040 }
  0x47   :  { %403 = dma.done.wait [#allocation6], 2304  }
  0x48   :  { %404 = vsyncadd [#allocation6], 4294964992 }
  0x49   :  { %405 = dma.done.wait [#allocation9], 16  }
  0x4a   :  { %406 = vsyncadd [#allocation9], 4294967280  ;;  %v75_v0 = vld [vmem:[#allocation7] sm:$0xff]  ;;  %v76_v1 = vld [vmem:[#allocation7 + $0x8] sm:$0xff]  ;;  %s415_s3 = smov [#allocation10]  }
  0x4b   :  { %v77_v2 = vld [vmem:[#allocation7 + $0x10] sm:$0xff]  ;;  %v252_v3 = vpack.c.bf16 %v76_v1, %v75_v0  ;;  %v78_v4 = vld [vmem:[#allocation7 + $0x18] sm:$0xff]  ;;  %v79_v7 = vld [vmem:[#allocation7 + $0x20] sm:$0xff]  ;;  %s184_s1 = sshll.u32 %s415_s3, 4  ;;  %s185_s1 = int_to_ptr.vmem [resolvable:$true] %s184_s1 }
  0x4c   :  { %v256_v5 = vpack.c.bf16 %v78_v4, %v77_v2  ;;  %v71_v6 = vld [vmem:[#allocation5] sm:$0xff]  ;;  %v80_v8 = vld [vmem:[#allocation7 + $0x28] sm:$0xff]  ;;  %v82_v11 = vld [vmem:[#allocation7 + $0x38] sm:$0xff]  ;;  %s379_s13 = scalar_lea.vmem %s185_s1, 256  ;;  %p384_p5 = scmp.lt.s32.totalorder %s185_s1, %s185_s1 }
  0x4d   :  { %253 = vmatprep.subr.bf16.mxu0 %v252_v3  ;;  %249 = vmatprep.mubr.f32.mxu0 %v71_v6  ;;  %v260_v9 = vpack.c.bf16 %v80_v8, %v79_v7  ;;  %v81_v10 = vld [vmem:[#allocation7 + $0x30] sm:$0xff]  ;;  %v83_v13 = vld [vmem:[#allocation7 + $0x40] sm:$0xff]  ;;  %v84_v14 = vld [vmem:[#allocation7 + $0x48] sm:$0xff]  ;;  %p380_p4 = scmp.ne.s32.totalorder %s185_s1, %s379_s13  ;;  %p385_p6 = scmp.lt.s32.totalorder %s379_s13, %s379_s13 }
  0x4e   :  { %255 = vmatpush3.bf16.xpose.msra.mxu0 %v252_v3  ;;  %v264_v12 = vpack.c.bf16 %v82_v11, %v81_v10  ;;  %v268_v15 = vpack.c.bf16 %v84_v14, %v83_v13  ;;  %v85_v16 = vld [vmem:[#allocation7 + $0x50] sm:$0xff]  ;;  %v86_v17 = vld [vmem:[#allocation7 + $0x58] sm:$0xff]  ;;  %v87_v19 = vld [vmem:[#allocation7 + $0x60] sm:$0xff] }
  0x4f   :  { %257 = vmatprep.subr.bf16.mxu0 %v256_v5  ;;  %v272_v18 = vpack.c.bf16 %v86_v17, %v85_v16  ;;  %v88_v20 = vld [vmem:[#allocation7 + $0x68] sm:$0xff]  ;;  %v89_v22 = vld [vmem:[#allocation7 + $0x70] sm:$0xff]  ;;  %v90_v23 = vld [vmem:[#allocation7 + $0x78] sm:$0xff]  ;;  %p386_p7 = por %p385_p6, %p384_p5 }
  0x50   :  { %v276_v21 = vpack.c.bf16 %v88_v20, %v87_v19  ;;  %v280_v24 = vpack.c.bf16 %v90_v23, %v89_v22  ;;  %v72_v25 = vld [vmem:[#allocation5 + $0x8] sm:$0xff]  ;;  %v198_v26 = vld [vmem:[#allocation8] ss:$0 sm:$0xff]  ;;  %v74_v27 = vld [vmem:[#allocation2 + $0x8] sm:$0xff] }
  0x51   :  { %v73_v30 = vld [vmem:[#allocation2] sm:$0xff]  ;;  %p387_p8 = pnand %p386_p7, %p380_p4 }
  0x56   :  { %259 = vmatpush3.bf16.xpose.msra.mxu0 %v256_v5 }
  0x57   :  { %261 = vmatprep.subr.bf16.mxu0 %v260_v9 }
  0x5e   :  { %263 = vmatpush3.bf16.xpose.msra.mxu0 %v260_v9 }
  0x5f   :  { %265 = vmatprep.subr.bf16.mxu0 %v264_v12 }
  0x66   :  { %267 = vmatpush3.bf16.xpose.msra.mxu0 %v264_v12 }
  0x67   :  { %269 = vmatprep.subr.bf16.mxu0 %v268_v15 }
  0x6e   :  { %271 = vmatpush3.bf16.xpose.msra.mxu0 %v268_v15 }
  0x6f   :  { %273 = vmatprep.subr.bf16.mxu0 %v272_v18 }
  0x76   :  { %275 = vmatpush3.bf16.xpose.msra.mxu0 %v272_v18 }
  0x77   :  { %277 = vmatprep.subr.bf16.mxu0 %v276_v21 }
  0x7e   :  { %279 = vmatpush3.bf16.xpose.msra.mxu0 %v276_v21 }
  0x7f   :  { %281 = vmatprep.subr.bf16.mxu0 %v280_v24 }
  0x86   :  { %283 = vmatpush3.bf16.xpose.msra.mxu0 %v280_v24 }
  0x8d   :  { %250 = vmatmul.mubr.f32.vlgmr.msra.gmra.mrb[0].mxu0 %v72_v25 }
 0x160   :  { %v251_v28 = vpop.f32.mrb[0].mxu0 }
 0x161   :  { %v170_v29 = vadd.f32 %v251_v28, %v198_v26  ;;  %v164_v31 = vpop.f32.mrb[1].mxu0 }
 0x162   :  { %v165_v32 = vadd.f32 %v198_v26, %v164_v31 }
 0x163   :  { %v174_v33 = vmul.f32 %v170_v29, %v74_v27 }
 0x164   :  { %v173_v34 = vmul.f32 %v165_v32, %v73_v30 }
 0x165   :  { %v176_v35 = vadd.f32 %v174_v33, %v72_v25 }
 0x166   :  { %v175_v36 = vadd.f32 %v173_v34, %v71_v6 }
 0x167   :  { %178 = vst [vmem:[#allocation10 + $0x8] sm:$0xff] %v176_v35 }
 0x168   :  { %177 = vst [vmem:[#allocation10] sm:$0xff] %v175_v36 }
 0x169   :  { %390 = shalt.err (!%p387_p8)
}
 0x16a   :  { %s391_s16 = scalar_lea.hbm %s524_s4, 256 }
 0x16b   :  { %p392_p9 = scmp.ne.s32.totalorder %s524_s4, %s391_s16  ;;  %p395_p10 = scmp.lt.u32.totalorder %s391_s16, %s524_s4 }
 0x16d   :  { %p397_p11 = pnand %p395_p10, %p392_p9 }
 0x16f   :  { %400 = shalt.err (!%p397_p11)
}
 0x170   :  { %190 = dma.vmem_to_hbm [thread:$0]  %s185_s1, 256, %s524_s4, [#allocation4], %s411_s27, %s411_s27, %s412_s28  }
 0x171   :  { %407 = dma.done.wait [#allocation4], 256  }
 0x172   :  { %408 = vsyncadd [#allocation4], 4294967040 }
 0x173   :  { %194 = vsyncpa [#allocation3], 1 }
 0x174   :  { %195 = vsyncpa [#allocation6], 1 }
 0x175   :  { %196 = vsyncpa [#allocation9], 1 }
 0x176   :  { %197 = vsyncpa [#allocation4], 1 }

</bundles_post_ra>
